<compile_context>
chip_gen: v7x
topology: tpu7x:2x2x1
jax: 0.10.0
libtpu: 0.0.40
codegen_flags: <defaults>
</compile_context>

<pallas_src>
import functools
import math

import jax
import jax.numpy as jnp
from jax import lax
from jax.experimental import pallas as pl
from jax.experimental.pallas import tpu as pltpu


def _round_up(x: int, m: int) -> int:
    return ((x + m - 1) // m) * m


def _pick_tile(dim: int, preferred: int, quantum: int) -> int:
    """Largest multiple-of-`quantum` divisor of `dim` that is <= `preferred`.
    Falls back to the full dimension (a full-extent block is always legal)."""
    if dim <= preferred:
        return dim
    cand = (preferred // quantum) * quantum
    while cand >= quantum:
        if dim % cand == 0:
            return cand
        cand -= quantum
    return dim


def _select_tiles(B: int, Opad: int, Ipad: int, budget_bytes: int = 36 << 20):
    """Pick (tb, tn, tk) so double-buffered x/w/out tiles + the two f32 accumulators
    fit a conservative scoped-VMEM budget (safe for v7x's 64 MiB physical VMEM;
    ample headroom on v5e/v6e's 128 MiB)."""

    def need(tb, tn, tk):
        # 2x double-buffered input/output tiles + single-buffered accumulators (f32).
        return 4 * (2 * (tb * tk + tn * tk + tb * tn) + 2 * tb * tn)

    # v6e/v7x MXUs are 2x 256x256 -> prefer tn multiples of 256 when possible.
    tn_quantum = 256 if Opad % 256 == 0 else 128
    best = None
    for tk_pref in (2048, 1024, 512, 256, 128):
        tk = _pick_tile(Ipad, tk_pref, 128)
        for tb_pref in (512, 256, 128, 64, 32, 16, 8):
            tb = _pick_tile(B, tb_pref, 8)
            for tn_pref in (512, 256, 128):
                tn = _pick_tile(Opad, tn_pref, tn_quantum)
                n = need(tb, tn, tk)
                if n <= budget_bytes:
                    return tb, tn, tk
                if best is None or n < best[0]:
                    best = (n, tb, tn, tk)
    # Pathological (huge, un-tileable dims): smallest candidate found.
    # TODO(synk): pad the batch dimension too for shapes with no sublane-aligned divisor.
    return best[1], best[2], best[3]


# ---------------------------------------------------------------------------
# Kernel: 2 MXU matmuls + in-kernel weight transform + elementwise epilogue.
# Grid = (batch tiles, out-feature tiles, in-feature tiles["arbitrary"]).
# ---------------------------------------------------------------------------
def _sign_linear_kernel(x_ref, w_ref, o_ref, mu_acc, var_acc, *,
                        mu_const: float, var_const: float, bf16_matmul: bool):
    k = pl.program_id(2)

    @pl.when(k == 0)
    def _init():
        mu_acc[...] = jnp.zeros_like(mu_acc)
        var_acc[...] = jnp.zeros_like(var_acc)

    a = x_ref[...].astype(jnp.float32)                    # (tb, tk)
    w = jax.nn.sigmoid(w_ref[...].astype(jnp.float32))    # (tn, tk), EUP; hidden under MXU

    am = a - 0.5                                          # (tb, tk)
    asq = 4.0 * (am * am)                                 # (2a-1)^2
    wm = 2.0 * w - 1.0                                    # (tn, tk)
    wv = w - w * w                                        # w(1-w)

    # Per-row sum of (2a-1)^2 over this K block (kept f32 regardless of bf16 flag).
    asq_row = jnp.sum(asq, axis=-1, keepdims=True)        # (tb, 1)

    if bf16_matmul:
        # ~3-4x MXU throughput on v6e/v7x; f32 accumulation preserved below.
        am = am.astype(jnp.bfloat16)
        asq = asq.astype(jnp.bfloat16)
        wm = wm.astype(jnp.bfloat16)
        wv = wv.astype(jnp.bfloat16)

    def dot_t(lhs, rhs):
        # (tb, tk) x (tn, tk) -> (tb, tn): contract the shared K axis on the MXU,
        # f32 accumulation, no transpose materialized.
        return lax.dot_general(lhs, rhs, (((1,), (1,)), ((), ())),
                               preferred_element_type=jnp.float32)

    mu_acc[...] += dot_t(am, wm)
    var_acc[...] += dot_t(asq, wv) - 0.25 * asq_row

    @pl.when(k == pl.num_programs(2) - 1)
    def _finalize():
        var = var_acc[...] + var_const                    # = sum_i p(1-p) + eps
        z = (mu_const - mu_acc[...]) * lax.rsqrt(2.0 * var)
        o_ref[...] = (0.5 - 0.5 * lax.erf(z)).astype(o_ref.dtype)


def sign_linear_slow(p_x: jax.Array, weight: jax.Array, *,
                     bf16_matmul: bool = False,
                     batch_tile: int | None = None,
                     out_tile: int | None = None,
                     k_tile: int | None = None) -> jax.Array:
    """p_x: (B, in_features) f32 probabilities; weight: (out_features, in_features) f32."""
    B, I = p_x.shape
    O, I_w = weight.shape
    assert I == I_w, "in_features mismatch"

    eps = 1e-6
    threshold = float(int(math.ceil(I / 2)))
    # threshold - 0.5 - mu  ==  mu_const - dot(a-0.5, (2w-1)^T)
    mu_const = threshold - 0.5 - 0.5 * float(I)
    # var + eps             ==  var_acc + var_const
    var_const = 0.25 * float(I) + eps

    # --- padding: lane-dense output stores + K-split-friendly in_features -------
    Opad = _round_up(O, 128)
    Ipad = _round_up(I, 128) if I > 128 else I
    if Opad != O:
        weight = jnp.pad(weight, ((0, Opad - O), (0, 0)))          # sigmoid(0)=0.5, sliced off
    if Ipad != I:
        # Padded columns contribute exactly zero: x pad = 0.5 -> (2a-1) = 0.
        p_x = jnp.pad(p_x, ((0, 0), (0, Ipad - I)), constant_values=0.5)
        weight = jnp.pad(weight, ((0, 0), (0, Ipad - I)))

    # --- VMEM-budget-aware tiles -------------------------------------------------
    tb, tn, tk = _select_tiles(B, Opad, Ipad)
    # Give v7x's two TensorCores >= 2 parallel grid steps when possible.
    if (B // tb) * (Opad // tn) < 2:
        if tb % 16 == 0:
            tb //= 2
        elif tn % 256 == 0:
            tn //= 2
    if batch_tile is not None:
        tb = batch_tile
    if out_tile is not None:
        tn = out_tile
    if k_tile is not None:
        tk = k_tile
    assert B % tb == 0 and Opad % tn == 0 and Ipad % tk == 0

    vmem_need = 4 * (2 * (tb * tk + tn * tk + tb * tn) + 2 * tb * tn)
    vmem_limit = int(min(max(vmem_need + (8 << 20), 32 << 20), 56 << 20))

    kernel = functools.partial(_sign_linear_kernel, mu_const=mu_const,
                               var_const=var_const, bf16_matmul=bf16_matmul)

    out = pl.pallas_call(
        kernel,
        out_shape=jax.ShapeDtypeStruct((B, Opad), jnp.float32),
        grid_spec=pltpu.PrefetchScalarGridSpec(
            num_scalar_prefetch=0,
            grid=(B // tb, Opad // tn, Ipad // tk),
            in_specs=[
                pl.BlockSpec((tb, tk), lambda i, j, k: (i, k)),    # p_x tile
                pl.BlockSpec((tn, tk), lambda i, j, k: (j, k)),    # raw weight tile
            ],
            out_specs=pl.BlockSpec((tb, tn), lambda i, j, k: (i, j)),
            scratch_shapes=[
                pltpu.VMEM((tb, tn), jnp.float32),                 # mu accumulator
                pltpu.VMEM((tb, tn), jnp.float32),                 # var accumulator
            ],
        ),
        compiler_params=pltpu.CompilerParams(
            dimension_semantics=("parallel", "parallel", "arbitrary"),
            vmem_limit_bytes=vmem_limit,
        ),
    )(p_x, weight)

    return out[:, :O] if Opad != O else out


def sign_linear_slow_ref(p_x, weight):
    """Pure-JAX reference mirroring the PyTorch forward exactly."""
    in_features = weight.shape[1]
    eps = 1e-6
    threshold = int(math.ceil(in_features / 2))
    root2 = math.sqrt(2.0)
    p_weight = jax.nn.sigmoid(weight)
    px = p_x[..., None, :]
    p_success = 2.0 * p_weight * px + 1.0 - px - p_weight
    mu = jnp.sum(p_success, axis=-1)
    sigma = jnp.sqrt(jnp.sum(p_success * (1.0 - p_success), axis=-1) + eps)
    return 0.5 - 0.5 * lax.erf((threshold - 0.5 - mu) / (sigma * root2))


if __name__ == "__main__":
    key = jax.random.PRNGKey(0)
    k_w, k_x = jax.random.split(key)

    batch = 8
    in_features = 32
    out_features = 16

    # reset_parameters(): uniform(-2, 2) on the weight — deterministic init here.
    weight = jax.random.uniform(
        k_w, (out_features, in_features), minval=-2.0, maxval=2.0, dtype=jnp.float32
    )
    # p_x is interpreted as per-feature probabilities in [0, 1].
    p_x = jax.random.uniform(k_x, (batch, in_features), dtype=jnp.float32)

    out = sign_linear_slow(p_x, weight)
    out = jax.block_until_ready(out)

    ref = sign_linear_slow_ref(p_x, weight)
    assert out.shape == (batch, out_features)
    assert jnp.allclose(out, ref, atol=1e-5, rtol=1e-5), "mismatch vs reference"

    print("KERNEL_OK")
</pallas_src>

<mosaic_0001>
module attributes {stable_mosaic.version = 11 : i64} {
  func.func @_sign_linear_kernel(%arg0: i32, %arg1: i32, %arg2: i32, %arg3: memref<8x32xf32, #tpu.memory_space<vmem>>, %arg4: memref<128x32xf32, #tpu.memory_space<vmem>>, %arg5: memref<8x128xf32, #tpu.memory_space<vmem>>, %arg6: memref<8x128xf32, #tpu.memory_space<vmem>>, %arg7: memref<8x128xf32, #tpu.memory_space<vmem>>) attributes {dimension_semantics = [#tpu.dimension_semantics<parallel>, #tpu.dimension_semantics<parallel>, #tpu.dimension_semantics<arbitrary>], iteration_bounds = array<i64: 1, 1, 1>, scalar_prefetch = 0 : i64, scratch_operands = 2 : i64, tpu.core_type = #tpu.core_type<tc>, window_params = [{transform_indices = @transform_0, window_bounds = array<i64: 8, 32>}, {transform_indices = @transform_1, window_bounds = array<i64: 128, 32>}, {transform_indices = @transform_2, window_bounds = array<i64: 8, 128>}]} {
    %c0_i32 = arith.constant 0 : i32
    %0 = arith.cmpi eq, %arg2, %c0_i32 : i32
    %1 = arith.extui %0 : i1 to i32
    %c0_i32_0 = arith.constant 0 : i32
    %2 = arith.cmpi ne, %1, %c0_i32_0 : i32
    scf.if %2 {
      %cst_22 = arith.constant 0.000000e+00 : f32
      %38 = vector.broadcast %cst_22 : f32 to vector<8x128xf32>
      %c0_23 = arith.constant 0 : index
      %c0_24 = arith.constant 0 : index
      %39 = vector.load %arg6[%c0_23, %c0_24] : memref<8x128xf32, #tpu.memory_space<vmem>>, vector<8x128xf32>
      tpu.vector_store %arg6[%c0_23, %c0_24], %38 {strides = array<i32>} : memref<8x128xf32, #tpu.memory_space<vmem>>, vector<8x128xf32>,
      %cst_25 = arith.constant 0.000000e+00 : f32
      %40 = vector.broadcast %cst_25 : f32 to vector<8x128xf32>
      %c0_26 = arith.constant 0 : index
      %c0_27 = arith.constant 0 : index
      %41 = vector.load %arg7[%c0_26, %c0_27] : memref<8x128xf32, #tpu.memory_space<vmem>>, vector<8x128xf32>
      tpu.vector_store %arg7[%c0_26, %c0_27], %40 {strides = array<i32>} : memref<8x128xf32, #tpu.memory_space<vmem>>, vector<8x128xf32>,
    } else {
    }
    %c0 = arith.constant 0 : index
    %c0_1 = arith.constant 0 : index
    %3 = vector.load %arg3[%c0, %c0_1] : memref<8x32xf32, #tpu.memory_space<vmem>>, vector<8x32xf32>
    %c0_2 = arith.constant 0 : index
    %c0_3 = arith.constant 0 : index
    %4 = vector.load %arg4[%c0_2, %c0_3] : memref<128x32xf32, #tpu.memory_space<vmem>>, vector<128x32xf32>
    %5 = arith.negf %4 : vector<128x32xf32>
    %6 = math.exp %5 : vector<128x32xf32>
    %cst = arith.constant 1.000000e+00 : f32
    %7 = vector.broadcast %cst : f32 to vector<128x32xf32>
    %8 = arith.addf %7, %6 : vector<128x32xf32>
    %9 = arith.divf %7, %8 : vector<128x32xf32>
    %cst_4 = arith.constant 5.000000e-01 : f32
    %10 = vector.broadcast %cst_4 : f32 to vector<8x32xf32>
    %11 = arith.subf %3, %10 : vector<8x32xf32>
    %12 = arith.mulf %11, %11 : vector<8x32xf32>
    %cst_5 = arith.constant 4.000000e+00 : f32
    %13 = vector.broadcast %cst_5 : f32 to vector<8x32xf32>
    %14 = arith.mulf %13, %12 : vector<8x32xf32>
    %cst_6 = arith.constant 2.000000e+00 : f32
    %15 = vector.broadcast %cst_6 : f32 to vector<128x32xf32>
    %16 = arith.mulf %15, %9 : vector<128x32xf32>
    %cst_7 = arith.constant 1.000000e+00 : f32
    %17 = vector.broadcast %cst_7 : f32 to vector<128x32xf32>
    %18 = arith.subf %16, %17 : vector<128x32xf32>
    %19 = arith.mulf %9, %9 : vector<128x32xf32>
    %20 = arith.subf %9, %19 : vector<128x32xf32>
    %cst_8 = arith.constant dense<0.000000e+00> : vector<8xf32>
    %21 = vector.multi_reduction <add>, %14, %cst_8 [1] : vector<8x32xf32> to vector<8xf32>
    %22 = vector.shape_cast %21 : vector<8xf32> to vector<8x1xf32>
    %c0_9 = arith.constant 0 : index
    %c0_10 = arith.constant 0 : index
    %23 = vector.load %arg6[%c0_9, %c0_10] : memref<8x128xf32, #tpu.memory_space<vmem>>, vector<8x128xf32>
    %cst_11 = arith.constant dense<0.000000e+00> : vector<8x128xf32>
    %24 = tpu.matmul %11, %18, %cst_11 {dimension_numbers = #tpu.dot_dimension_numbers<[1], [1], [0], [0], [0, 0, 1, 0], [], []>} : vector<8x32xf32>, vector<128x32xf32>, vector<8x128xf32> -> vector<8x128xf32>
    %25 = arith.addf %23, %24 : vector<8x128xf32>
    %c0_12 = arith.constant 0 : index
    %c0_13 = arith.constant 0 : index
    %26 = vector.load %arg6[%c0_12, %c0_13] : memref<8x128xf32, #tpu.memory_space<vmem>>, vector<8x128xf32>
    tpu.vector_store %arg6[%c0_12, %c0_13], %25 {strides = array<i32>} : memref<8x128xf32, #tpu.memory_space<vmem>>, vector<8x128xf32>,
    %c0_14 = arith.constant 0 : index
    %c0_15 = arith.constant 0 : index
    %27 = vector.load %arg7[%c0_14, %c0_15] : memref<8x128xf32, #tpu.memory_space<vmem>>, vector<8x128xf32>
    %cst_16 = arith.constant dense<0.000000e+00> : vector<8x128xf32>
    %28 = tpu.matmul %14, %20, %cst_16 {dimension_numbers = #tpu.dot_dimension_numbers<[1], [1], [0], [0], [0, 0, 1, 0], [], []>} : vector<8x32xf32>, vector<128x32xf32>, vector<8x128xf32> -> vector<8x128xf32>
    %cst_17 = arith.constant 2.500000e-01 : f32
    %29 = vector.broadcast %cst_17 : f32 to vector<8x1xf32>
    %30 = arith.mulf %29, %22 : vector<8x1xf32>
    %31 = vector.broadcast %30 : vector<8x1xf32> to vector<8x128xf32>
    %32 = arith.subf %28, %31 : vector<8x128xf32>
    %33 = arith.addf %27, %32 : vector<8x128xf32>
    %c0_18 = arith.constant 0 : index
    %c0_19 = arith.constant 0 : index
    %34 = vector.load %arg7[%c0_18, %c0_19] : memref<8x128xf32, #tpu.memory_space<vmem>>, vector<8x128xf32>
    tpu.vector_store %arg7[%c0_18, %c0_19], %33 {strides = array<i32>} : memref<8x128xf32, #tpu.memory_space<vmem>>, vector<8x128xf32>,
    %c0_i32_20 = arith.constant 0 : i32
    %35 = arith.cmpi eq, %arg2, %c0_i32_20 : i32
    %36 = arith.extui %35 : i1 to i32
    %c0_i32_21 = arith.constant 0 : i32
    %37 = arith.cmpi ne, %36, %c0_i32_21 : i32
    scf.if %37 {
      %c0_22 = arith.constant 0 : index
      %c0_23 = arith.constant 0 : index
      %38 = vector.load %arg7[%c0_22, %c0_23] : memref<8x128xf32, #tpu.memory_space<vmem>>, vector<8x128xf32>
      %cst_24 = arith.constant 8.00000095 : f32
      %39 = vector.broadcast %cst_24 : f32 to vector<8x128xf32>
      %40 = arith.addf %38, %39 : vector<8x128xf32>
      %c0_25 = arith.constant 0 : index
      %c0_26 = arith.constant 0 : index
      %41 = vector.load %arg6[%c0_25, %c0_26] : memref<8x128xf32, #tpu.memory_space<vmem>>, vector<8x128xf32>
      %cst_27 = arith.constant -5.000000e-01 : f32
      %42 = vector.broadcast %cst_27 : f32 to vector<8x128xf32>
      %43 = arith.subf %42, %41 : vector<8x128xf32>
      %cst_28 = arith.constant 2.000000e+00 : f32
      %44 = vector.broadcast %cst_28 : f32 to vector<8x128xf32>
      %45 = arith.mulf %44, %40 : vector<8x128xf32>
      %46 = math.rsqrt %45 : vector<8x128xf32>
      %47 = arith.mulf %43, %46 : vector<8x128xf32>
      %48 = math.erf %47 : vector<8x128xf32>
      %cst_29 = arith.constant 5.000000e-01 : f32
      %49 = vector.broadcast %cst_29 : f32 to vector<8x128xf32>
      %50 = arith.mulf %49, %48 : vector<8x128xf32>
      %cst_30 = arith.constant 5.000000e-01 : f32
      %51 = vector.broadcast %cst_30 : f32 to vector<8x128xf32>
      %52 = arith.subf %51, %50 : vector<8x128xf32>
      %c0_31 = arith.constant 0 : index
      %c0_32 = arith.constant 0 : index
      %53 = vector.load %arg5[%c0_31, %c0_32] : memref<8x128xf32, #tpu.memory_space<vmem>>, vector<8x128xf32>
      tpu.vector_store %arg5[%c0_31, %c0_32], %52 {strides = array<i32>} : memref<8x128xf32, #tpu.memory_space<vmem>>, vector<8x128xf32>,
    } else {
    }
    return
  }
  func.func @transform_0(%arg0: i32, %arg1: i32, %arg2: i32) -> (i32, i32) {
    %c0_i32 = arith.constant 0 : i32
    return %arg0, %arg2 : i32, i32
  }
  func.func @transform_1(%arg0: i32, %arg1: i32, %arg2: i32) -> (i32, i32) {
    %c0_i32 = arith.constant 0 : i32
    return %arg1, %arg2 : i32, i32
  }
  func.func @transform_2(%arg0: i32, %arg1: i32, %arg2: i32) -> (i32, i32) {
    %c0_i32 = arith.constant 0 : i32
    return %arg0, %arg1 : i32, i32
  }
}

</mosaic_0001>

<bundles_post_ra>
// kernel: tpu_custom_call.1
= control target key start
LH: loop header
LB: loop body
LE: loop exit
PB: predicated region body
PF: predicated region fallthrough
CT: control target
= control target key end

     0   :  { %v811_v3 = vmov 0.0|0.0   ;;  %vm812_vm0 = vmmov 0   ;;  %v813_v15 = vmov 0.0   ;;  %s959_s0 = inlined_call_operand.vmem [shape: f32[8,32], index: 0, kind: input, shape index: {}]   ;;  %s960_s1 = inlined_call_operand.vmem [shape: f32[128,32], index: 1, kind: input, shape index: {}]   ;;  %s961_s2 = inlined_call_operand.hbm [shape: f32[8,128], index: 2, kind: output, shape index: {}]  }
   0x1   :  { %v19_v0 = vld [vmem:[%s960_s1] sm:$0xff]  ;;  %v20_v1 = vld [vmem:[%s960_s1 + $0x8] sm:$0xff]  ;;  %v21_v2 = vld [vmem:[%s960_s1 + $0x10] sm:$0xff]  ;;  %683 = vmatprep.subr.bf16.mxu1 %v811_v3  ;;  %651 = vmatprep.subr.bf16.mxu0 %v811_v3 }
   0x2   :  { %v480_v4 = vmul.f32 -1.442695, %v19_v0  ;;  %v481_v5 = vmul.f32 -1.442695, %v20_v1  ;;  %v22_v6 = vld [vmem:[%s960_s1 + $0x18] sm:$0xff]  ;;  %v23_v7 = vld [vmem:[%s960_s1 + $0x20] sm:$0xff]  ;;  %648 = vmatprep.mubr.msk.f32.mxu1 %vm812_vm0, %v813_v15  ;;  %613 = vmatprep.mubr.msk.f32.mxu0 %vm812_vm0, %v813_v15 }
   0x3   :  { %v482_v8 = vmul.f32 -1.442695, %v21_v2  ;;  %v483_v9 = vmul.f32 -1.442695, %v22_v6  ;;  %v24_v10 = vld [vmem:[%s960_s1 + $0x28] sm:$0xff]  ;;  %v25_v13 = vld [vmem:[%s960_s1 + $0x30] sm:$0xff] }
   0x4   :  { %719 = vpow2.f32 %v480_v4  ;;  %v484_v11 = vmul.f32 -1.442695, %v23_v7  ;;  %v485_v12 = vmul.f32 -1.442695, %v24_v10  ;;  %v26_v14 = vld [vmem:[%s960_s1 + $0x38] sm:$0xff]  ;;  %v18_v16 = vld [vmem:[%s959_s0] sm:$0xff] }
   0x5   :  { %721 = vpow2.f32 %v481_v5  ;;  %v859_v17 = vadd.f32 -0.5, %v18_v16 }
   0x6   :  { %723 = vpow2.f32 %v482_v8 }
   0x7   :  { %725 = vpow2.f32 %v483_v9 }
   0x8   :  { %727 = vpow2.f32 %v484_v11 }
   0x9   :  { %729 = vpow2.f32 %v485_v12 }
   0xa   :  { %7 = vsyncpa [#allocation5], 0  ;;  %v486_v18 = vmul.f32 -1.442695, %v25_v13  ;;  %v487_v19 = vmul.f32 -1.442695, %v26_v14  ;;  %v132_v20 = vmul.f32 %v859_v17, %v859_v17 }
   0xb   :  { %v27_v22 = vld [vmem:[%s960_s1 + $0x40] sm:$0xff]  ;;  %vm198_vm1 = vcmask 261120   ;;  %v28_v31 = vld [vmem:[%s960_s1 + $0x48] sm:$0xff]  ;;  %v29_v38 = vld [vmem:[%s960_s1 + $0x50] sm:$0xff] }
   0xc   :  { %v866_v23 = vmul.f32 4.0, %v132_v20  ;;  %731 = vpow2.f32 %v486_v18  ;;  %v488_v32 = vmul.f32 -1.442695, %v27_v22  ;;  %v489_v36 = vmul.f32 -1.442695, %v28_v31  ;;  %v30_v40 = vld [vmem:[%s960_s1 + $0x58] sm:$0xff]  ;;  %vm884_vm2 = vmpackc.low %vm198_vm1, %vm198_vm1 }
   0xd   :  { %733 = vpow2.f32 %v487_v19  ;;  %v490_v41 = vmul.f32 -1.442695, %v29_v38  ;;  %v491_v43 = vmul.f32 -1.442695, %v30_v40  ;;  %v31_v59 = vld [vmem:[%s960_s1 + $0x60] sm:$0xff]  ;;  %v32_v5 = vld [vmem:[%s960_s1 + $0x68] sm:$0xff] }
   0xe   :  { %v720_v21 = vpop.eup %719  ;;  %v199_v28 = vsel %vm198_vm1, %v866_v23, 0.0  ;;  %v492_v6 = vmul.f32 -1.442695, %v31_v59  ;;  %v493_v15 = vmul.f32 -1.442695, %v32_v5  ;;  %v34_v31 = vld [vmem:[%s960_s1 + $0x78] sm:$0xff] }
   0xf   :  { %v722_v24 = vpop.eup %721  ;;  %v83_v25 = vadd.f32 1.0, %v720_v21  ;;  %200 = vadd.xlane.f32.xlu0 %v199_v28  ;;  %v33_v28 = vld [vmem:[%s960_s1 + $0x70] sm:$0xff]  ;;  %v495_v38 = vmul.f32 -1.442695, %v34_v31  ;;  %s814_s1 = smov [#allocation4]  }
  0x10   :  { %v724_v26 = vpop.eup %723  ;;  %v84_v27 = vadd.f32 1.0, %v722_v24  ;;  %s472_s14 = sshll.u32 %s814_s1, 4  ;;  %s473_s14 = int_to_ptr.vmem [resolvable:$true] %s472_s14 }
  0x11   :  { %v726_v29 = vpop.eup %725  ;;  %735 = vrcp.f32 %v83_v25  ;;  %v85_v30 = vadd.f32 1.0, %v724_v26  ;;  %s787_s15 = scalar_lea.vmem %s473_s14, 128  ;;  %p792_p1 = scmp.lt.s32.totalorder %s473_s14, %s473_s14 }
  0x12   :  { %v728_v33 = vpop.eup %727  ;;  %737 = vrcp.f32 %v84_v27  ;;  %v86_v34 = vadd.f32 1.0, %v726_v29  ;;  %p788_p0 = scmp.ne.s32.totalorder %s473_s14, %s787_s15  ;;  %p793_p2 = scmp.lt.s32.totalorder %s787_s15, %s787_s15 }
  0x13   :  { %v730_v35 = vpop.eup %729  ;;  %739 = vrcp.f32 %v85_v30  ;;  %v87_v37 = vadd.f32 1.0, %v728_v33 }
  0x14   :  { %741 = vrcp.f32 %v86_v34  ;;  %v88_v39 = vadd.f32 1.0, %v730_v35  ;;  %p794_p3 = por %p793_p2, %p792_p1 }
  0x15   :  { %743 = vpow2.f32 %v488_v32 }
  0x16   :  { %745 = vpow2.f32 %v489_v36  ;;  %v732_v42 = vpop.eup %731  ;;  %p795_p4 = pnand %p794_p3, %p788_p0 }
  0x17   :  { %747 = vrcp.f32 %v87_v37  ;;  %v734_v44 = vpop.eup %733  ;;  %v89_v49 = vadd.f32 1.0, %v732_v42  ;;  %v494_v37 = vmul.f32 -1.442695, %v33_v28 }
  0x18   :  { %749 = vrcp.f32 %v88_v39  ;;  %v90_v53 = vadd.f32 1.0, %v734_v44 }
  0x19   :  { %751 = vpow2.f32 %v490_v41 }
  0x1a   :  { %753 = vpow2.f32 %v491_v43 }
  0x1b   :  { %v736_v45 = vpop.eup %735  ;;  %755 = vrcp.f32 %v89_v49 }
  0x1c   :  { %v738_v46 = vpop.eup %737  ;;  %v166_v47 = vmul.f32 %v736_v45, %v736_v45  ;;  %v134_v48 = vmul.f32 2.0, %v736_v45  ;;  %757 = vrcp.f32 %v90_v53 }
  0x1d   :  { %v740_v50 = vpop.eup %739  ;;  %v167_v51 = vmul.f32 %v738_v46, %v738_v46  ;;  %v135_v52 = vmul.f32 2.0, %v738_v46  ;;  %759 = vpow2.f32 %v492_v6 }
  0x1e   :  { %v742_v54 = vpop.eup %741  ;;  %v182_v55 = vsub.f32 %v736_v45, %v166_v47  ;;  %v168_v56 = vmul.f32 %v740_v50, %v740_v50  ;;  %v497_v57 = vadd.f32 -1.0, %v134_v48  ;;  %v136_v58 = vmul.f32 2.0, %v740_v50 }
  0x1f   :  { %v744_v60 = vpop.eup %743  ;;  %v183_v61 = vsub.f32 %v738_v46, %v167_v51  ;;  %v169_v62 = vmul.f32 %v742_v54, %v742_v54  ;;  %v498_v63 = vadd.f32 -1.0, %v135_v52  ;;  %v137_v0 = vmul.f32 2.0, %v742_v54 }
  0x20   :  { %v746_v7 = vpop.eup %745  ;;  %v91_v8 = vadd.f32 1.0, %v744_v60  ;;  %v184_v10 = vsub.f32 %v740_v50, %v168_v56  ;;  %v499_v12 = vadd.f32 -1.0, %v136_v58 }
  0x21   :  { %v684_v2 = vpack.c.bf16 %v183_v61, %v182_v55  ;;  %v652_v4 = vpack.c.bf16 %v498_v63, %v497_v57  ;;  %v748_v9 = vpop.eup %747  ;;  %v185_v11 = vsub.f32 %v742_v54, %v169_v62  ;;  %v500_v13 = vadd.f32 -1.0, %v137_v0 }
  0x22   :  { %v750_v14 = vpop.eup %749  ;;  %v92_v16 = vadd.f32 1.0, %v746_v7  ;;  %v170_v19 = vmul.f32 %v748_v9, %v748_v9  ;;  %v138_v20 = vmul.f32 2.0, %v748_v9  ;;  %761 = vrcp.f32 %v91_v8 }
  0x23   :  { %686 = vmatpush3.bf16.xpose.msk.msra.mxu1 %vm884_vm2, %v684_v2  ;;  %654 = vmatpush3.bf16.xpose.msk.msra.mxu0 %vm884_vm2, %v652_v4  ;;  %v752_v18 = vpop.eup %751  ;;  %v688_v22 = vpack.c.bf16 %v185_v11, %v184_v10  ;;  %v171_v24 = vmul.f32 %v750_v14, %v750_v14  ;;  %v656_v25 = vpack.c.bf16 %v500_v13, %v499_v12  ;;  %v139_v26 = vmul.f32 2.0, %v750_v14 }
  0x24   :  { %687 = vmatprep.subr.bf16.mxu1 %v811_v3  ;;  %655 = vmatprep.subr.bf16.mxu0 %v811_v3  ;;  %v754_v21 = vpop.eup %753  ;;  %763 = vpow2.f32 %v493_v15  ;;  %v93_v27 = vadd.f32 1.0, %v752_v18  ;;  %v186_v33 = vsub.f32 %v748_v9, %v170_v19  ;;  %v501_v35 = vadd.f32 -1.0, %v138_v20 }
  0x25   :  { %765 = vrcp.f32 %v92_v16  ;;  %v756_v29 = vpop.eup %755  ;;  %v94_v30 = vadd.f32 1.0, %v754_v21  ;;  %v187_v34 = vsub.f32 %v750_v14, %v171_v24  ;;  %v502_v36 = vadd.f32 -1.0, %v139_v26 }
  0x26   :  { %v758_v32 = vpop.eup %757  ;;  %767 = vrcp.f32 %v93_v27  ;;  %v172_v39 = vmul.f32 %v756_v29, %v756_v29  ;;  %v140_v44 = vmul.f32 2.0, %v756_v29 }
  0x27   :  { %v173_v40 = vmul.f32 %v758_v32, %v758_v32  ;;  %769 = vrcp.f32 %v94_v30  ;;  %v760_v41 = vpop.eup %759  ;;  %v692_v42 = vpack.c.bf16 %v187_v34, %v186_v33  ;;  %v660_v43 = vpack.c.bf16 %v502_v36, %v501_v35 }
  0x28   :  { %v141_v45 = vmul.f32 2.0, %v758_v32  ;;  %771 = vpow2.f32 %v494_v37  ;;  %v188_v49 = vsub.f32 %v756_v29, %v172_v39  ;;  %v503_v51 = vadd.f32 -1.0, %v140_v44 }
  0x29   :  { %773 = vpow2.f32 %v495_v38  ;;  %v189_v50 = vsub.f32 %v758_v32, %v173_v40  ;;  %v95_v53 = vadd.f32 1.0, %v760_v41 }
  0x2a   :  { %v504_v52 = vadd.f32 -1.0, %v141_v45 }
  0x2b   :  { %690 = vmatpush3.bf16.xpose.msk.msra.mxu1 %vm884_vm2, %v688_v22  ;;  %658 = vmatpush3.bf16.xpose.msk.msra.mxu0 %vm884_vm2, %v656_v25  ;;  %v696_v58 = vpack.c.bf16 %v189_v50, %v188_v49  ;;  %775 = vrcp.f32 %v95_v53 }
  0x2c   :  { %691 = vmatprep.subr.bf16.mxu1 %v811_v3  ;;  %659 = vmatprep.subr.bf16.mxu0 %v811_v3  ;;  %v762_v46 = vpop.eup %761  ;;  %v664_v59 = vpack.c.bf16 %v504_v52, %v503_v51 }
  0x2d   :  { %v174_v55 = vmul.f32 %v762_v46, %v762_v46  ;;  %v142_v60 = vmul.f32 2.0, %v762_v46 }
  0x2e   :  { %v764_v47 = vpop.eup %763 }
  0x2f   :  { %v766_v48 = vpop.eup %765  ;;  %v96_v54 = vadd.f32 1.0, %v764_v47  ;;  %v190_v2 = vsub.f32 %v762_v46, %v174_v55  ;;  %v505_v5 = vadd.f32 -1.0, %v142_v60 }
  0x30   :  { %v175_v56 = vmul.f32 %v766_v48, %v766_v48  ;;  %v768_v57 = vpop.eup %767  ;;  %v143_v61 = vmul.f32 2.0, %v766_v48 }
  0x31   :  { %v770_v62 = vpop.eup %769  ;;  %777 = vrcp.f32 %v96_v54  ;;  %v176_v8 = vmul.f32 %v768_v57, %v768_v57  ;;  %v144_v13 = vmul.f32 2.0, %v768_v57 }
  0x32   :  { %v772_v63 = vpop.eup %771  ;;  %v191_v4 = vsub.f32 %v766_v48, %v175_v56  ;;  %v506_v6 = vadd.f32 -1.0, %v143_v61  ;;  %v177_v9 = vmul.f32 %v770_v62, %v770_v62  ;;  %v145_v14 = vmul.f32 2.0, %v770_v62 }
  0x33   :  { %694 = vmatpush3.bf16.xpose.msk.msra.mxu1 %vm884_vm2, %v692_v42  ;;  %662 = vmatpush3.bf16.xpose.msk.msra.mxu0 %vm884_vm2, %v660_v43  ;;  %v774_v0 = vpop.eup %773  ;;  %v97_v7 = vadd.f32 1.0, %v772_v63  ;;  %v192_v18 = vsub.f32 %v768_v57, %v176_v8  ;;  %v507_v20 = vadd.f32 -1.0, %v144_v13 }
  0x34   :  { %695 = vmatprep.subr.bf16.mxu1 %v811_v3  ;;  %663 = vmatprep.subr.bf16.mxu0 %v811_v3  ;;  %v98_v10 = vadd.f32 1.0, %v774_v0  ;;  %v700_v11 = vpack.c.bf16 %v191_v4, %v190_v2  ;;  %v668_v12 = vpack.c.bf16 %v506_v6, %v505_v5  ;;  %v193_v19 = vsub.f32 %v770_v62, %v177_v9 }
  0x35   :  { %779 = vrcp.f32 %v97_v7  ;;  %v776_v15 = vpop.eup %775  ;;  %v508_v21 = vadd.f32 -1.0, %v145_v14 }
  0x36   :  { %781 = vrcp.f32 %v98_v10  ;;  %v178_v22 = vmul.f32 %v776_v15, %v776_v15  ;;  %v146_v25 = vmul.f32 2.0, %v776_v15  ;;  %v704_v27 = vpack.c.bf16 %v193_v19, %v192_v18 }
  0x37   :  { %v672_v28 = vpack.c.bf16 %v508_v21, %v507_v20 }
  0x38   :  { %v194_v29 = vsub.f32 %v776_v15, %v178_v22  ;;  %v509_v31 = vadd.f32 -1.0, %v146_v25 }
  0x3b   :  { %698 = vmatpush3.bf16.xpose.msk.msra.mxu1 %vm884_vm2, %v696_v58  ;;  %666 = vmatpush3.bf16.xpose.msk.msra.mxu0 %vm884_vm2, %v664_v59  ;;  %v778_v16 = vpop.eup %777 }
  0x3c   :  { %699 = vmatprep.subr.bf16.mxu1 %v811_v3  ;;  %667 = vmatprep.subr.bf16.mxu0 %v811_v3  ;;  %v179_v24 = vmul.f32 %v778_v16, %v778_v16  ;;  %v147_v26 = vmul.f32 2.0, %v778_v16 }
  0x3e   :  { %v195_v30 = vsub.f32 %v778_v16, %v179_v24  ;;  %v510_v32 = vadd.f32 -1.0, %v147_v26 }
  0x3f   :  { %v780_v33 = vpop.eup %779 }
  0x40   :  { %v782_v34 = vpop.eup %781  ;;  %v708_v35 = vpack.c.bf16 %v195_v30, %v194_v29  ;;  %v676_v36 = vpack.c.bf16 %v510_v32, %v509_v31  ;;  %v180_v37 = vmul.f32 %v780_v33, %v780_v33  ;;  %v148_v39 = vmul.f32 2.0, %v780_v33 }
  0x41   :  { %v181_v38 = vmul.f32 %v782_v34, %v782_v34  ;;  %v149_v40 = vmul.f32 2.0, %v782_v34 }
  0x42   :  { %v196_v41 = vsub.f32 %v780_v33, %v180_v37  ;;  %v511_v43 = vadd.f32 -1.0, %v148_v39 }
  0x43   :  { %702 = vmatpush3.bf16.xpose.msk.msra.mxu1 %vm884_vm2, %v700_v11  ;;  %670 = vmatpush3.bf16.xpose.msk.msra.mxu0 %vm884_vm2, %v668_v12  ;;  %v197_v42 = vsub.f32 %v782_v34, %v181_v38  ;;  %v512_v44 = vadd.f32 -1.0, %v149_v40 }
  0x44   :  { %703 = vmatprep.subr.bf16.mxu1 %v811_v3  ;;  %671 = vmatprep.subr.bf16.mxu0 %v811_v3 }
  0x45   :  { %v712_v45 = vpack.c.bf16 %v197_v42, %v196_v41  ;;  %v680_v46 = vpack.c.bf16 %v512_v44, %v511_v43 }
  0x4b   :  { %706 = vmatpush3.bf16.xpose.msk.msra.mxu1 %vm884_vm2, %v704_v27  ;;  %674 = vmatpush3.bf16.xpose.msk.msra.mxu0 %vm884_vm2, %v672_v28 }
  0x4c   :  { %707 = vmatprep.subr.bf16.mxu1 %v811_v3  ;;  %675 = vmatprep.subr.bf16.mxu0 %v811_v3 }
  0x53   :  { %710 = vmatpush3.bf16.xpose.msk.msra.mxu1 %vm884_vm2, %v708_v35  ;;  %678 = vmatpush3.bf16.xpose.msk.msra.mxu0 %vm884_vm2, %v676_v36 }
  0x54   :  { %711 = vmatprep.subr.bf16.mxu1 %v811_v3  ;;  %679 = vmatprep.subr.bf16.mxu0 %v811_v3 }
  0x5b   :  { %714 = vmatpush3.bf16.xpose.msk.msra.mxu1 %vm884_vm2, %v712_v45  ;;  %682 = vmatpush3.bf16.xpose.msk.msra.mxu0 %vm884_vm2, %v680_v46 }
  0x62   :  { %649 = vmatmul.mubr.msk.f32.vlgmr.msra.gmra.mrb[0].mxu1 %vm198_vm1, %v866_v23  ;;  %614 = vmatmul.mubr.msk.f32.vlgmr.msra.gmra.mrb[0].mxu0 %vm198_vm1, %v859_v17 }
  0x9c   :  { %v201_v47 = vpop.xlane.xlu0 %200 }
  0x9d   :  { %v448_v48 = vmul.f32 0.25, %v201_v47 }
 0x135   :  { %v444_v49 = vpop.f32.mrb[0].mxu1  ;;  %v320_v50 = vpop.f32.mrb[0].mxu0 }
 0x136   :  { %v449_v51 = vsub.f32 %v444_v49, %v448_v48  ;;  %v650_v3 = vpop.f32.mrb[1].mxu1  ;;  %v615_v52 = vpop.f32.mrb[1].mxu0  ;;  %v458_v55 = vsub.f32 -0.5, %v320_v50 }
 0x138   :  { %v456_v53 = vadd.f32 8.000001, %v449_v51 }
 0x13a   :  { %v459_v54 = vmul.f32 2.0, %v456_v53 }
 0x13c   :  { %783 = vrsqrt.f32 %v459_v54 }
 0x146   :  { %v784_v56 = vpop.eup %783 }
 0x147   :  { %v461_v1 = vmul.f32 %v784_v56, %v458_v55 }
 0x149   :  { %785 = verf.f32 %v461_v1 }
 0x153   :  { %v786_v57 = vpop.eup %785 }
 0x154   :  { %v463_v23 = vmul.f32 0.5, %v786_v57 }
 0x156   :  { %v464_v58 = vsub.f32 0.5, %v463_v23 }
 0x158   :  { %465 = vst [vmem:[#allocation4] sm:$0xff] %v464_v58 }
 0x159   :  { %798 = shalt.err (!%p795_p4)
}
 0x15a   :  { %s799_s18 = scalar_lea.hbm %s961_s2, 128 }
 0x15b   :  { %p800_p5 = scmp.ne.s32.totalorder %s961_s2, %s799_s18  ;;  %p803_p6 = scmp.lt.u32.totalorder %s799_s18, %s961_s2 }
 0x15d   :  { %p805_p7 = pnand %p803_p6, %p800_p5 }
 0x15f   :  { %808 = shalt.err (!%p805_p7)
}
 0x160   :  { %475 = dma.vmem_to_hbm [thread:$0]  %s473_s14, 128, %s961_s2, [#allocation5]  }
 0x161   :  { %809 = dma.done.wait [#allocation5], 128  }
 0x162   :  { %810 = vsyncadd [#allocation5], 4294967168 }
 0x163   :  { %479 = vsyncpa [#allocation5], 1 }

</bundles_post_ra>
